<compile_context>
chip_gen: v7x
topology: tpu7x:2x2x1
jax: 0.10.0
libtpu: 0.0.40
codegen_flags: <defaults>
</compile_context>

<pallas_src>
import functools

import jax
import jax.numpy as jnp
from jax.experimental import pallas as pl
from jax.experimental.pallas import tpu as pltpu


_LANE = 128
_TARGET_TILE_BYTES = 4 * 1024 * 1024   # per-array tile (~4 MiB)
# 3 arrays (2 in + 1 out) x 2 pipeline buffers x 4 MiB ~= 24 MiB; give headroom
# while staying under v7x's 64 MiB physical VMEM.
_VMEM_LIMIT_BYTES = 48 * 1024 * 1024


def _uar_combine_kernel(x_ref, adv_ref, o_ref):
    """out = inputs + nan_to_num(adv - inputs)   (tail of UARAttack.forward)."""
    x = x_ref[...]
    pert = adv_ref[...] - x
    pert = jnp.where(jnp.isnan(pert), jnp.zeros_like(pert), pert)
    o_ref[...] = x + pert


def _pick_2d_view(shape):
    """(rows, cols) view of the flat array: lane-dense (cols = 128*k) whenever
    the element count allows; otherwise keep the original trailing dim at full
    extent (correct, no padding, no extra HBM traffic -- just lane-masked
    stores on this rare path)."""
    total = 1
    for d in shape:
        total *= d
    if total % _LANE == 0:
        for k in (8, 4, 2, 1):
            cols = _LANE * k
            if total % cols == 0:
                return total // cols, cols
    cols = shape[-1] if len(shape) >= 1 else 1
    return total // cols, cols


def _uar_combine_impl(inputs, adv_examples):
    orig_shape = inputs.shape
    dtype = inputs.dtype
    itemsize = jnp.dtype(dtype).itemsize

    rows, cols = _pick_2d_view(orig_shape)
    x2d = inputs.reshape(rows, cols)
    adv2d = adv_examples.astype(dtype).reshape(rows, cols)

    # Row tile: byte-sized target, rounded to the dtype's sublane packing
    # (f32 -> 8, bf16 -> 16, int8/fp8 -> 32) so every vld/vst is unmasked.
    packing = max(8, 32 // itemsize)
    tile_rows = (_TARGET_TILE_BYTES // itemsize) // cols
    tr = max(packing, (tile_rows // packing) * packing)
    if rows <= tr:
        tr = rows  # full extent: always a legal block
    grid = (pl.cdiv(rows, tr),)

    total = rows * cols
    cost = pl.CostEstimate(
        flops=3 * total, transcendentals=0, bytes_accessed=3 * total * itemsize)

    out2d = pl.pallas_call(
        _uar_combine_kernel,
        out_shape=jax.ShapeDtypeStruct((rows, cols), dtype),
        grid=grid,
        in_specs=[
            pl.BlockSpec((tr, cols), lambda i: (i, 0)),
            pl.BlockSpec((tr, cols), lambda i: (i, 0)),
        ],
        out_specs=pl.BlockSpec((tr, cols), lambda i: (i, 0)),
        input_output_aliases={1: 0},  # output reuses adv's HBM buffer
        cost_estimate=cost,
        compiler_params=pltpu.CompilerParams(
            dimension_semantics=("parallel",),
            vmem_limit_bytes=_VMEM_LIMIT_BYTES,
        ),
    )(x2d, adv2d)

    return out2d.reshape(orig_shape)


_uar_combine = jax.jit(_uar_combine_impl)


def uar_attack(inputs, labels=None, adv_examples=None):
    """Pallas equivalent of UARAttack.forward(inputs, labels).

    `adv_examples` stands in for the output of the external UAR attack.  When
    it is None the attack cannot be run and the forward pass degenerates to
    the identity, so we return `inputs` directly (no copy, no kernel launch).
    `labels` is accepted for signature parity; the combine step does not use it.
    """
    del labels
    if adv_examples is None:
        # TODO(synk): get_uar_attack / the inner PGD loop needs the external UAR
        # library and the wrapped classifier model; identity fallback instead.
        return inputs
    return _uar_combine(inputs, adv_examples)


if __name__ == "__main__":
    key = jax.random.PRNGKey(0)
    k_x, k_a, k_y, k_n, k_x2, k_a2, k_n2 = jax.random.split(key, 7)

    # Small NCHW image batch consistent with the attack module.
    x = jax.random.normal(k_x, (2, 4, 16, 16), dtype=jnp.float32)
    labels = jax.random.randint(k_y, (2,), 0, 10)

    # Stand-in adversarial examples from the (external) UAR attack, with NaNs
    # injected so the NaN-scrub path of forward() is exercised.
    adv = x + 0.03 * jax.random.normal(k_a, x.shape, dtype=jnp.float32)
    nan_mask = jax.random.bernoulli(k_n, 0.05, x.shape)
    adv = jnp.where(nan_mask, jnp.nan, adv)

    out = jax.block_until_ready(uar_attack(x, labels, adv))

    # Pure-JAX reference of the forward() tail.
    pert = adv - x
    ref = x + jnp.where(jnp.isnan(pert), 0.0, pert)

    assert out.shape == x.shape and out.dtype == x.dtype
    assert not bool(jnp.any(jnp.isnan(out)))
    assert bool(jnp.allclose(out, ref)), "mismatch vs reference"

    # Exercise the non-128-multiple fallback path (trailing dim at full extent,
    # no padding): 2*3*5*7 = 210 elements.
    x_odd = jax.random.normal(k_x2, (2, 3, 5, 7), dtype=jnp.float32)
    adv_odd = x_odd + 0.03 * jax.random.normal(k_a2, x_odd.shape, dtype=jnp.float32)
    adv_odd = jnp.where(jax.random.bernoulli(k_n2, 0.05, x_odd.shape),
                        jnp.nan, adv_odd)
    out_odd = jax.block_until_ready(uar_attack(x_odd, None, adv_odd))
    pert_odd = adv_odd - x_odd
    ref_odd = x_odd + jnp.where(jnp.isnan(pert_odd), 0.0, pert_odd)
    assert out_odd.shape == x_odd.shape
    assert not bool(jnp.any(jnp.isnan(out_odd)))
    assert bool(jnp.allclose(out_odd, ref_odd)), "mismatch vs reference (odd shape)"

    # Identity path (attack unavailable): returns inputs untouched, no kernel.
    ident = uar_attack(x, labels)
    assert bool(jnp.all(ident == x))

    print("KERNEL_OK")
</pallas_src>

<mosaic_0001>
module attributes {stable_mosaic.version = 11 : i64} {
  func.func @_uar_combine_kernel(%arg0: i32, %arg1: memref<2x1024xf32, #tpu.memory_space<vmem>>, %arg2: memref<2x1024xf32, #tpu.memory_space<vmem>>, %arg3: memref<2x1024xf32, #tpu.memory_space<vmem>>) attributes {dimension_semantics = [#tpu.dimension_semantics<parallel>], iteration_bounds = array<i64: 1>, scalar_prefetch = 0 : i64, scratch_operands = 0 : i64, tpu.core_type = #tpu.core_type<tc>, window_params = [{transform_indices = @transform_0, window_bounds = array<i64: 2, 1024>}, {transform_indices = @transform_1, window_bounds = array<i64: 2, 1024>}, {transform_indices = @transform_2, window_bounds = array<i64: 2, 1024>}]} {
    %c0 = arith.constant 0 : index
    %c0_0 = arith.constant 0 : index
    %0 = vector.load %arg1[%c0, %c0_0] : memref<2x1024xf32, #tpu.memory_space<vmem>>, vector<2x1024xf32>
    %c0_1 = arith.constant 0 : index
    %c0_2 = arith.constant 0 : index
    %1 = vector.load %arg2[%c0_1, %c0_2] : memref<2x1024xf32, #tpu.memory_space<vmem>>, vector<2x1024xf32>
    %2 = arith.subf %1, %0 : vector<2x1024xf32>
    %3 = arith.cmpf one, %2, %2 : vector<2x1024xf32>
    %cst = arith.constant 0.000000e+00 : f32
    %4 = vector.broadcast %cst : f32 to vector<2x1024xf32>
    %5 = arith.select %3, %4, %2 : vector<2x1024xi1>, vector<2x1024xf32>
    %6 = arith.addf %0, %5 : vector<2x1024xf32>
    %c0_3 = arith.constant 0 : index
    %c0_4 = arith.constant 0 : index
    %7 = vector.load %arg3[%c0_3, %c0_4] : memref<2x1024xf32, #tpu.memory_space<vmem>>, vector<2x1024xf32>
    tpu.vector_store %arg3[%c0_3, %c0_4], %6 {strides = array<i32>} : memref<2x1024xf32, #tpu.memory_space<vmem>>, vector<2x1024xf32>,
    return
  }
  func.func @transform_0(%arg0: i32) -> (i32, i32) {
    %c0_i32 = arith.constant 0 : i32
    %c0_i32_0 = arith.constant 0 : i32
    return %arg0, %c0_i32 : i32, i32
  }
  func.func @transform_1(%arg0: i32) -> (i32, i32) {
    %c0_i32 = arith.constant 0 : i32
    %c0_i32_0 = arith.constant 0 : i32
    return %arg0, %c0_i32 : i32, i32
  }
  func.func @transform_2(%arg0: i32) -> (i32, i32) {
    %c0_i32 = arith.constant 0 : i32
    %c0_i32_0 = arith.constant 0 : i32
    return %arg0, %c0_i32 : i32, i32
  }
}

</mosaic_0001>

<bundles_post_ra>
// kernel: _uar_combine_impl.1
= control target key start
LH: loop header
LB: loop body
LE: loop exit
PB: predicated region body
PF: predicated region fallthrough
CT: control target
= control target key end

     0   :  { %s62_s0 = inlined_call_operand.vmem [shape: f32[2,1024], index: 0, kind: input, shape index: {}]   ;;  %s63_s1 = inlined_call_operand.vmem [shape: f32[2,1024], index: 1, kind: input, shape index: {}, may-alias: {1,2}]   ;;  %s64_s2 = inlined_call_operand.vmem [shape: f32[2,1024], index: 2, kind: output, shape index: {}, may-alias: {1,2}]  }
   0x1   :  { %v11_v0 = vld [vmem:[%s62_s0] sm:$0xff]  ;;  %v12_v2 = vld [vmem:[%s62_s0 + $0x8] sm:$0xff] }
   0x2   :  { %v13_v1 = vld [vmem:[%s63_s1] sm:$0xff]  ;;  %v14_v4 = vld [vmem:[%s63_s1 + $0x8] sm:$0xff] }
   0x3   :  { %v15_v3 = vsub.f32 %v13_v1, %v11_v0  ;;  %v16_v5 = vsub.f32 %v14_v4, %v12_v2 }
   0x5   :  { %vm17_vm0 = vcmp.ne.f32.partialorder %v15_v3, %v15_v3  ;;  %vm18_vm1 = vcmp.ne.f32.partialorder %v16_v5, %v16_v5 }
   0x6   :  { %v19_v6 = vsel %vm17_vm0, 0.0, %v15_v3  ;;  %v20_v8 = vsel %vm18_vm1, 0.0, %v16_v5 }
   0x7   :  { %v21_v7 = vadd.f32 %v19_v6, %v11_v0  ;;  %v22_v9 = vadd.f32 %v20_v8, %v12_v2 }
   0x9   :  { %23 = vst [vmem:[%s64_s2] sm:$0xff] %v21_v7  ;;  %24 = vst [vmem:[%s64_s2 + $0x8] sm:$0xff] %v22_v9 }

</bundles_post_ra>
